<compile_context>
chip_gen: v7x
topology: tpu7x:2x2x1
jax: 0.10.0
libtpu: 0.0.40
codegen_flags: <defaults>
</compile_context>

<pallas_src>
import math
import functools

import jax
import jax.numpy as jnp
from jax.experimental import pallas as pl
from jax.experimental.pallas import tpu as pltpu


# --------------------------------------------------------------------------- #
# Kernels
# --------------------------------------------------------------------------- #
def _posenc_add_kernel(x_ref, pe_ref, o_ref):
    # eval mode: pure elementwise add (dropout is identity)
    o_ref[...] = x_ref[...] + pe_ref[...]


def _posenc_dropout_kernel(x_ref, pe_ref, bits_ref, o_ref, *, threshold, scale):
    # train mode: add + inverted dropout via integer threshold on uint32 bits
    y = x_ref[...] + pe_ref[...]
    keep = bits_ref[...] >= jnp.uint32(threshold)
    o_ref[...] = jnp.where(keep, y * jnp.asarray(scale, dtype=y.dtype),
                           jnp.zeros_like(y))


# --------------------------------------------------------------------------- #
# Wrapper
# --------------------------------------------------------------------------- #
def _dropout_threshold(p):
    # keep element iff uint32 bits >= threshold  (keep prob = 1 - p)
    return min(int(round(float(p) * 4294967296.0)), 4294967295)


def _choose_seq_tile(S, B, E, itemsize, train,
                     vmem_budget_bytes=16 * 1024 * 1024):
    """Rows per tile so double-buffered (x + pe + out [+ bits]) fits the budget."""
    row_bytes = B * E * itemsize * 3          # x tile + pe tile + out tile
    if train:
        row_bytes += B * E * 4                # uint32 bits tile
    row_bytes *= 2                            # double buffering
    rows = vmem_budget_bytes // max(row_bytes, 1)
    if rows >= S:
        return S                              # whole array in one (full-dim) block
    return max(8, (rows // 8) * 8)            # sublane-aligned tile


def positional_encoding_forward(x, pe, *, dropout_p=0.1, train=True,
                                rng=None, seq_tile=None):
    """x: (S, B, E).  pe: (max_len, E) sin/cos table (sliced to S inside)."""
    S, B, E = x.shape
    pe = pe[:S].astype(x.dtype)                     # pe[:x.size(0)], model dtype
    # lane-dense 2-D views: last dim is the full B*E extent
    x2 = x.reshape(S, B * E)
    pe2 = jnp.tile(pe, (1, B))                      # (S, B*E), one-time cost

    apply_dropout = bool(train) and float(dropout_p) > 0.0
    ts = seq_tile if seq_tile is not None else _choose_seq_tile(
        S, B, E, jnp.dtype(x.dtype).itemsize, apply_dropout)
    grid = (pl.cdiv(S, ts),)
    blk = lambda i: (i, 0)
    big_spec = pl.BlockSpec((ts, B * E), blk)

    compiler_params = pltpu.CompilerParams(
        dimension_semantics=("parallel",),          # tiles independent -> 2 TCs on v7x
        vmem_limit_bytes=32 * 1024 * 1024,          # explicit, safe on v5e/v6e/v7x
    )

    if apply_dropout:
        if rng is None:
            rng = jax.random.PRNGKey(0)
        bits = jax.random.bits(rng, (S, B * E), dtype=jnp.uint32)
        kernel = functools.partial(
            _posenc_dropout_kernel,
            threshold=_dropout_threshold(dropout_p),
            scale=1.0 / (1.0 - float(dropout_p)),
        )
        out2 = pl.pallas_call(
            kernel,
            out_shape=jax.ShapeDtypeStruct((S, B * E), x.dtype),
            grid=grid,
            in_specs=[big_spec, big_spec, big_spec],
            out_specs=big_spec,
            compiler_params=compiler_params,
        )(x2, pe2, bits)
    else:
        out2 = pl.pallas_call(
            _posenc_add_kernel,
            out_shape=jax.ShapeDtypeStruct((S, B * E), x.dtype),
            grid=grid,
            in_specs=[big_spec, big_spec],
            out_specs=big_spec,
            compiler_params=compiler_params,
        )(x2, pe2)

    return out2.reshape(S, B, E)


def make_positional_encoding(max_len, embedding_dims, dtype=jnp.float32):
    """Deterministic pe buffer, identical math to the PyTorch __init__."""
    position = jnp.arange(max_len, dtype=jnp.float32)[:, None]
    div_term = jnp.exp(
        jnp.arange(0, embedding_dims, 2, dtype=jnp.float32)
        * (-math.log(10000.0) / embedding_dims)
    )
    pe = jnp.zeros((max_len, embedding_dims), dtype=jnp.float32)
    pe = pe.at[:, 0::2].set(jnp.sin(position * div_term))
    pe = pe.at[:, 1::2].set(jnp.cos(position * div_term))
    return pe.astype(dtype)


# --------------------------------------------------------------------------- #
# Demo / correctness checks
# --------------------------------------------------------------------------- #
if __name__ == "__main__":
    S, B, E = 8, 2, 32          # seq_len, batch, embedding_dims
    MAX_LEN = 64
    P = 0.1

    key = jax.random.PRNGKey(0)
    kx, kd = jax.random.split(key)
    x = jax.random.normal(kx, (S, B, E), dtype=jnp.float32)
    pe_full = make_positional_encoding(MAX_LEN, E)      # (max_len, E) buffer

    # training-mode forward (add + fused inverted dropout)
    out_train = positional_encoding_forward(x, pe_full, dropout_p=P,
                                            train=True, rng=kd)
    jax.block_until_ready(out_train)

    # eval-mode forward (dropout is identity)
    out_eval = positional_encoding_forward(x, pe_full, dropout_p=P, train=False)
    jax.block_until_ready(out_eval)

    pe_b = pe_full[:S].astype(x.dtype)[:, None, :]      # (S, 1, E) broadcast form
    ref_eval = x + pe_b
    assert out_eval.shape == (S, B, E) and out_eval.dtype == x.dtype
    assert jnp.allclose(out_eval, ref_eval, atol=1e-6), "eval-mode mismatch"

    # exact train-mode reference: regenerate the same bits the wrapper used
    bits = jax.random.bits(kd, (S, B * E), dtype=jnp.uint32).reshape(S, B, E)
    keep = bits >= jnp.uint32(_dropout_threshold(P))
    ref_train = jnp.where(keep, (x + pe_b) * jnp.float32(1.0 / (1.0 - P)), 0.0)
    assert out_train.shape == (S, B, E) and out_train.dtype == x.dtype
    assert jnp.allclose(out_train, ref_train, atol=1e-6), "train-mode mismatch"

    # statistical sanity: keep-rate ~= 1 - p
    keep_rate = float(jnp.mean((out_train != 0).astype(jnp.float32)))
    assert abs(keep_rate - (1.0 - P)) < 0.15, f"keep-rate {keep_rate} off"

    print("KERNEL_OK")
</pallas_src>

<mosaic_0001>
module attributes {stable_mosaic.version = 11 : i64} {
  func.func @_posenc_dropout_kernel(%arg0: i32, %arg1: memref<8x64xf32, #tpu.memory_space<vmem>>, %arg2: memref<8x64xf32, #tpu.memory_space<vmem>>, %arg3: memref<8x64xi32, #tpu.memory_space<vmem>>, %arg4: memref<8x64xf32, #tpu.memory_space<vmem>>) attributes {dimension_semantics = [#tpu.dimension_semantics<parallel>], iteration_bounds = array<i64: 1>, scalar_prefetch = 0 : i64, scratch_operands = 0 : i64, tpu.core_type = #tpu.core_type<tc>, window_params = [{transform_indices = @transform_0, window_bounds = array<i64: 8, 64>}, {transform_indices = @transform_1, window_bounds = array<i64: 8, 64>}, {transform_indices = @transform_2, window_bounds = array<i64: 8, 64>}, {transform_indices = @transform_3, window_bounds = array<i64: 8, 64>}]} {
    %c0 = arith.constant 0 : index
    %c0_0 = arith.constant 0 : index
    %0 = vector.load %arg1[%c0, %c0_0] : memref<8x64xf32, #tpu.memory_space<vmem>>, vector<8x64xf32>
    %c0_1 = arith.constant 0 : index
    %c0_2 = arith.constant 0 : index
    %1 = vector.load %arg2[%c0_1, %c0_2] : memref<8x64xf32, #tpu.memory_space<vmem>>, vector<8x64xf32>
    %2 = arith.addf %0, %1 : vector<8x64xf32>
    %c0_3 = arith.constant 0 : index
    %c0_4 = arith.constant 0 : index
    %3 = vector.load %arg3[%c0_3, %c0_4] : memref<8x64xi32, #tpu.memory_space<vmem>>, vector<8x64xi32>
    %c429496730_i32 = arith.constant 429496730 : i32
    %4 = vector.broadcast %c429496730_i32 : i32 to vector<8x64xi32>
    %5 = arith.cmpi uge, %3, %4 : vector<8x64xi32>
    %cst = arith.constant 1.11111116 : f32
    %6 = vector.broadcast %cst : f32 to vector<8x64xf32>
    %7 = arith.mulf %2, %6 : vector<8x64xf32>
    %cst_5 = arith.constant 0.000000e+00 : f32
    %8 = vector.broadcast %cst_5 : f32 to vector<8x64xf32>
    %9 = arith.select %5, %7, %8 : vector<8x64xi1>, vector<8x64xf32>
    %c0_6 = arith.constant 0 : index
    %c0_7 = arith.constant 0 : index
    %10 = vector.load %arg4[%c0_6, %c0_7] : memref<8x64xf32, #tpu.memory_space<vmem>>, vector<8x64xf32>
    tpu.vector_store %arg4[%c0_6, %c0_7], %9 {strides = array<i32>} : memref<8x64xf32, #tpu.memory_space<vmem>>, vector<8x64xf32>,
    return
  }
  func.func @transform_0(%arg0: i32) -> (i32, i32) {
    %c0_i32 = arith.constant 0 : i32
    %c0_i32_0 = arith.constant 0 : i32
    return %arg0, %c0_i32 : i32, i32
  }
  func.func @transform_1(%arg0: i32) -> (i32, i32) {
    %c0_i32 = arith.constant 0 : i32
    %c0_i32_0 = arith.constant 0 : i32
    return %arg0, %c0_i32 : i32, i32
  }
  func.func @transform_2(%arg0: i32) -> (i32, i32) {
    %c0_i32 = arith.constant 0 : i32
    %c0_i32_0 = arith.constant 0 : i32
    return %arg0, %c0_i32 : i32, i32
  }
  func.func @transform_3(%arg0: i32) -> (i32, i32) {
    %c0_i32 = arith.constant 0 : i32
    %c0_i32_0 = arith.constant 0 : i32
    return %arg0, %c0_i32 : i32, i32
  }
}

</mosaic_0001>

<bundles_post_ra>
// kernel: tpu_custom_call.1
= control target key start
LH: loop header
LB: loop body
LE: loop exit
PB: predicated region body
PF: predicated region fallthrough
CT: control target
= control target key end

     0   :  { %8 = vsyncpa [#allocation3], 0  ;;  %s245_s0 = inlined_call_operand.hbm [shape: f32[8,64], index: 0, kind: input, shape index: {}]   ;;  %s246_s1 = inlined_call_operand.hbm [shape: f32[8,64], index: 1, kind: input, shape index: {}]   ;;  %s247_s2 = inlined_call_operand.hbm [shape: u32[8,64], index: 2, kind: input, shape index: {}]   ;;  %s248_s3 = inlined_call_operand.hbm [shape: f32[8,64], index: 3, kind: output, shape index: {}]  }
   0x1   :  { %9 = vsyncpa [#allocation6], 0 }
   0x2   :  { %10 = vsyncpa [#allocation4], 0  ;;  %s173_s12 = smov [#allocation5]   ;;  %s174_s14 = smov [#allocation2]  }
   0x3   :  { %s27_s13 = sshll.u32 %s173_s12, 4  ;;  %s17_s15 = sshll.u32 %s174_s14, 4  ;;  %s28_s13 = int_to_ptr.vmem [resolvable:$true] %s27_s13  ;;  %s18_s15 = int_to_ptr.vmem [resolvable:$true] %s17_s15 }
   0x4   :  { %s79_s18 = scalar_lea.hbm %s246_s1, 128 }
   0x5   :  { %p80_p0 = scmp.ne.s32.totalorder %s246_s1, %s79_s18  ;;  %p83_p1 = scmp.lt.u32.totalorder %s79_s18, %s246_s1 }
   0x7   :  { %p85_p2 = pnand %p83_p1, %p80_p0 }
   0x9   :  { %88 = shalt.err (!%p85_p2)
}
   0xa   :  { %s89_s23 = scalar_lea.vmem %s28_s13, 128  ;;  %p94_p4 = scmp.lt.s32.totalorder %s28_s13, %s28_s13 }
   0xb   :  { %p90_p3 = scmp.ne.s32.totalorder %s28_s13, %s89_s23  ;;  %p95_p5 = scmp.lt.s32.totalorder %s89_s23, %s89_s23 }
   0xd   :  { %p96_p6 = por %p95_p5, %p94_p4 }
   0xf   :  { %p97_p7 = pnand %p96_p6, %p90_p3 }
  0x11   :  { %100 = shalt.err (!%p97_p7)
}
  0x12   :  { %30 = dma.hbm_to_vmem [thread:$0]  %s246_s1, 128, %s28_s13, [#allocation6]  }
  0x13   :  { %s101_s28 = scalar_lea.hbm %s245_s0, 128 }
  0x14   :  { %p102_p8 = scmp.ne.s32.totalorder %s245_s0, %s101_s28  ;;  %p105_p9 = scmp.lt.u32.totalorder %s101_s28, %s245_s0 }
  0x16   :  { %p107_p10 = pnand %p105_p9, %p102_p8 }
  0x18   :  { %110 = shalt.err (!%p107_p10)
}
  0x19   :  { %s111_s6 = scalar_lea.vmem %s18_s15, 128  ;;  %p116_p12 = scmp.lt.s32.totalorder %s18_s15, %s18_s15 }
  0x1a   :  { %p112_p11 = scmp.ne.s32.totalorder %s18_s15, %s111_s6  ;;  %p117_p13 = scmp.lt.s32.totalorder %s111_s6, %s111_s6 }
  0x1c   :  { %p118_p0 = por %p117_p13, %p116_p12 }
  0x1e   :  { %p119_p1 = pnand %p118_p0, %p112_p11 }
  0x20   :  { %122 = shalt.err (!%p119_p1)
}
  0x21   :  { %20 = dma.hbm_to_vmem [thread:$0]  %s245_s0, 128, %s18_s15, [#allocation3]  }
  0x22   :  { %s175_s8 = smov [#allocation7]   ;;  %s123_s12 = scalar_lea.hbm %s247_s2, 128 }
  0x23   :  { %s37_s9 = sshll.u32 %s175_s8, 4  ;;  %p124_p2 = scmp.ne.s32.totalorder %s247_s2, %s123_s12  ;;  %s38_s9 = int_to_ptr.vmem [resolvable:$true] %s37_s9 }
  0x24   :  { %p127_p3 = scmp.lt.u32.totalorder %s123_s12, %s247_s2 }
  0x26   :  { %p129_p4 = pnand %p127_p3, %p124_p2 }
  0x28   :  { %132 = shalt.err (!%p129_p4)
}
  0x29   :  { %s133_s18 = scalar_lea.vmem %s38_s9, 128  ;;  %p138_p6 = scmp.lt.s32.totalorder %s38_s9, %s38_s9 }
  0x2a   :  { %p134_p5 = scmp.ne.s32.totalorder %s38_s9, %s133_s18  ;;  %p139_p7 = scmp.lt.s32.totalorder %s133_s18, %s133_s18 }
  0x2c   :  { %p140_p8 = por %p139_p7, %p138_p6 }
  0x2e   :  { %p141_p9 = pnand %p140_p8, %p134_p5 }
  0x30   :  { %144 = shalt.err (!%p141_p9)
}
  0x31   :  { %40 = dma.hbm_to_vmem [thread:$0]  %s247_s2, 128, %s38_s9, [#allocation6]  }
  0x32   :  { %167 = dma.done.wait [#allocation3], 128  }
  0x33   :  { %168 = vsyncadd [#allocation3], 4294967168 }
  0x34   :  { %169 = dma.done.wait [#allocation6], 256  }
  0x35   :  { %170 = vsyncadd [#allocation6], 4294967040  ;;  %v50_v0 = vld [vmem:[#allocation2] sm:$0xff]  ;;  %v51_v1 = vld [vmem:[#allocation5] sm:$0xff]  ;;  %s176_s19 = smov [#allocation8]   ;;  %vm57_vm1 = vcmask 523264  }
  0x36   :  { %v53_v2 = vld [vmem:[#allocation7] sm:$0xff]  ;;  %v52_v3 = vadd.f32 %v51_v1, %v50_v0  ;;  %s65_s20 = sshll.u32 %s176_s19, 4  ;;  %s66_s20 = int_to_ptr.vmem [resolvable:$true] %s65_s20 }
  0x37   :  { %vm54_vm0 = vcmp.ge.u32.totalorder %v53_v2, 429496730  ;;  %s145_s21 = scalar_lea.vmem %s66_s20, 128  ;;  %p150_p11 = scmp.lt.s32.totalorder %s66_s20, %s66_s20 }
  0x38   :  { %v55_v4 = vmul.f32 1.1111112, %v52_v3  ;;  %p146_p10 = scmp.ne.s32.totalorder %s66_s20, %s145_s21  ;;  %p151_p12 = scmp.lt.s32.totalorder %s145_s21, %s145_s21 }
  0x3a   :  { %v56_v5 = vsel %vm54_vm0, %v55_v4, 0.0  ;;  %p152_p13 = por %p151_p12, %p150_p11 }
  0x3b   :  { %58 = vst.msk [vmem:[#allocation8] sm:$0xff] %vm57_vm1, %v56_v5 }
  0x3c   :  { %p153_p0 = pnand %p152_p13, %p146_p10 }
  0x3e   :  { %156 = shalt.err (!%p153_p0)
}
  0x3f   :  { %s157_s23 = scalar_lea.hbm %s248_s3, 128 }
  0x40   :  { %p158_p1 = scmp.ne.s32.totalorder %s248_s3, %s157_s23  ;;  %p161_p2 = scmp.lt.u32.totalorder %s157_s23, %s248_s3 }
  0x42   :  { %p163_p3 = pnand %p161_p2, %p158_p1 }
  0x44   :  { %166 = shalt.err (!%p163_p3)
}
  0x45   :  { %68 = dma.vmem_to_hbm [thread:$0]  %s66_s20, 128, %s248_s3, [#allocation4]  }
  0x46   :  { %171 = dma.done.wait [#allocation4], 128  }
  0x47   :  { %172 = vsyncadd [#allocation4], 4294967168 }
  0x48   :  { %72 = vsyncpa [#allocation3], 1 }
  0x49   :  { %73 = vsyncpa [#allocation6], 1 }
  0x4a   :  { %74 = vsyncpa [#allocation4], 1 }

</bundles_post_ra>
